<compile_context>
chip_gen: v7x
topology: tpu7x:2x2x1
jax: 0.10.0
libtpu: 0.0.40
codegen_flags: <defaults>
</compile_context>

<pallas_src>
import functools
import math

import jax
import jax.numpy as jnp
from jax.experimental import pallas as pl
from jax.experimental.pallas import tpu as pltpu


def _bert_attn_kernel(x_ref, mask_ref,
                      wq_ref, wk_ref, wv_ref,
                      bq_ref, bk_ref, bv_ref,
                      o_ref, *, heads_per_block, head_dim):
    x = x_ref[0]                                     # [S, H], native dtype
    in_dtype = x.dtype

    # Projections for this block of heads only.  Weights arrive pre-transposed
    # ([in, out_block]) with the 1/sqrt(D) scale already folded into Wq/bq.
    # MXU consumes native-dtype operands; f32 accumulation via
    # preferred_element_type.
    q = jnp.dot(x, wq_ref[...], preferred_element_type=jnp.float32) + bq_ref[...]
    k = jnp.dot(x, wk_ref[...], preferred_element_type=jnp.float32) + bk_ref[...]
    v = jnp.dot(x, wv_ref[...], preferred_element_type=jnp.float32) + bv_ref[...]

    mask = mask_ref[0].astype(jnp.float32)           # [1 or S, S], broadcasts

    for h in range(heads_per_block):                 # static unroll over heads
        lo, hi = h * head_dim, (h + 1) * head_dim
        qh = q[:, lo:hi].astype(in_dtype)            # [S, D]
        kh = k[:, lo:hi].astype(in_dtype)
        vh = v[:, lo:hi].astype(in_dtype)

        # scores = (qh_scaled) @ kh^T + mask (contract on head_dim directly).
        scores = jax.lax.dot_general(
            qh, kh, (((1,), (1,)), ((), ())),
            preferred_element_type=jnp.float32) + mask

        # Numerically-stable softmax over keys, f32 math; normalize with a
        # row-wise reciprocal (EUP) instead of a per-element divide.
        scores = scores - jnp.max(scores, axis=-1, keepdims=True)
        e = jnp.exp(scores)
        inv = pl.reciprocal(jnp.sum(e, axis=-1, keepdims=True), approx=True)
        probs = (e * inv).astype(in_dtype)
        # TODO(synk): attention-prob dropout is identity in eval mode (no RNG);
        # head_mask is None in this forward path and is therefore skipped.

        ctx = jnp.dot(probs, vh, preferred_element_type=jnp.float32)  # [S, D]
        # Immediate per-head store -> frees live ranges each iteration; the
        # HBM writeback of the whole output block stays lane-dense.
        o_ref[0, :, lo:hi] = ctx.astype(o_ref.dtype)


def _pick_heads_per_block(num_heads, head_dim):
    """Largest-value head blocking: prefer output-column blocks that are a
    multiple of 128 lanes and >= 256 (full MXU width on v6e/v7x)."""
    divisors = [g for g in range(1, num_heads + 1) if num_heads % g == 0]
    for g in divisors:
        w = g * head_dim
        if w % 128 == 0 and w >= 256:
            return g
    for g in divisors:
        if (g * head_dim) % 128 == 0:
            return g
    return num_heads


def prepare_bert_attention_params(wq, bq, wk, bk, wv, bv, *, num_heads):
    """One-time parameter prep (hoist out of the per-call hot path).

    wq/wk/wv are nn.Linear weights in PyTorch layout [out, in]; bq/bk/bv [out].
    Returns pre-transposed weights with 1/sqrt(head_dim) folded into Q.
    """
    wq = jnp.asarray(wq)
    H = wq.shape[0]
    assert H % num_heads == 0
    head_dim = H // num_heads
    scale = 1.0 / math.sqrt(head_dim)

    wq_t = (wq * scale).T.astype(wq.dtype)           # fold scale into Q proj
    wk_t = jnp.asarray(wk).T
    wv_t = jnp.asarray(wv).T
    bq2 = (jnp.asarray(bq) * scale).reshape(1, H).astype(jnp.float32)
    bk2 = jnp.asarray(bk).reshape(1, H).astype(jnp.float32)
    bv2 = jnp.asarray(bv).reshape(1, H).astype(jnp.float32)
    return wq_t, wk_t, wv_t, bq2, bk2, bv2


def _prep_mask(attention_mask, B, S):
    """Normalize the additive mask to [B, Sq, S] with Sq in {1, S} (no [B,S,S]
    materialization for the standard broadcastable BERT extended mask)."""
    m = jnp.asarray(attention_mask, jnp.float32)
    if m.ndim == 4:
        if m.shape[1] != 1:
            raise ValueError("per-head attention masks [B,NH,S,S] are not supported")
        m = m[:, 0]                                  # [B, Sq, S]
    elif m.ndim == 2:
        m = m[:, None, :]                            # [B, 1, S]
    elif m.ndim != 3:
        raise ValueError(f"unsupported attention_mask rank {m.ndim}")
    if m.shape[-1] != S or m.shape[1] not in (1, S):
        raise ValueError(f"unsupported attention_mask shape {m.shape}")
    Sq = m.shape[1]
    return jnp.broadcast_to(m, (B, Sq, S))


def bert_self_attention(hidden_states, attention_mask, params, *, num_heads):
    """hidden_states: [B, S, H]; attention_mask: additive, [B,1,1,S] / [B,1,S,S]
    / [B,S,S] / [B,S].  Returns the context layer [B, S, H]
    (output_attentions path not returned)."""
    wq_t, wk_t, wv_t, bq2, bk2, bv2 = params
    B, S, H = hidden_states.shape
    assert H % num_heads == 0
    head_dim = H // num_heads

    hpb = _pick_heads_per_block(num_heads, head_dim)
    gw = hpb * head_dim                              # output columns per step
    ng = num_heads // hpb                            # head-block grid extent

    m = _prep_mask(attention_mask, B, S)
    Sq = m.shape[1]

    kernel = functools.partial(_bert_attn_kernel,
                               heads_per_block=hpb, head_dim=head_dim)

    x_isz = jnp.dtype(hidden_states.dtype).itemsize
    w_isz = jnp.dtype(wq_t.dtype).itemsize

    # Per-step VMEM need (double-buffered pipeline blocks + f32 intermediates),
    # used to derive vmem_limit_bytes instead of a fixed constant.
    est = (2 * S * H * x_isz                         # x block
           + 2 * Sq * S * 4                          # mask block
           + 2 * S * gw * x_isz                      # out block
           + 2 * 3 * H * gw * w_isz + 2 * 3 * gw * 4  # weight / bias blocks
           + 3 * S * gw * 4                          # q / k / v (f32)
           + 3 * S * S * 4                           # scores / exp temporaries
           + S * gw * 4)                             # ctx
    try:
        vmem_cap = int(getattr(pltpu.get_tpu_info(), "vmem_capacity_bytes",
                               64 * 1024 * 1024))
    except Exception:                                # pragma: no cover
        vmem_cap = 64 * 1024 * 1024
    vmem_limit = int(min(max(32 * 1024 * 1024, int(est * 1.5) + (1 << 20)),
                         vmem_cap * 7 // 8))

    cost = pl.CostEstimate(
        flops=6 * B * S * H * H + 4 * B * S * S * H,
        transcendentals=B * num_heads * S * S,
        bytes_accessed=2 * B * S * H * x_isz + B * Sq * S * 4
                       + 3 * H * H * w_isz + 3 * H * 4,
    )

    out = pl.pallas_call(
        kernel,
        out_shape=jax.ShapeDtypeStruct((B, S, H), hidden_states.dtype),
        grid_spec=pltpu.PrefetchScalarGridSpec(
            num_scalar_prefetch=0,
            grid=(B, ng),
            in_specs=[
                pl.BlockSpec((1, S, H), lambda b, g: (b, 0, 0)),   # x
                pl.BlockSpec((1, Sq, S), lambda b, g: (b, 0, 0)),  # additive mask
                pl.BlockSpec((H, gw), lambda b, g: (0, g)),        # Wq^T (scaled)
                pl.BlockSpec((H, gw), lambda b, g: (0, g)),        # Wk^T
                pl.BlockSpec((H, gw), lambda b, g: (0, g)),        # Wv^T
                pl.BlockSpec((1, gw), lambda b, g: (0, g)),        # bq (scaled)
                pl.BlockSpec((1, gw), lambda b, g: (0, g)),        # bk
                pl.BlockSpec((1, gw), lambda b, g: (0, g)),        # bv
            ],
            out_specs=pl.BlockSpec((1, S, gw), lambda b, g: (b, 0, g)),
        ),
        compiler_params=pltpu.CompilerParams(
            dimension_semantics=("parallel", "parallel"),
            vmem_limit_bytes=vmem_limit),
        cost_estimate=cost,
    )(hidden_states, m, wq_t, wk_t, wv_t, bq2, bk2, bv2)
    return out


if __name__ == "__main__":
    # Small config consistent with the module: hidden=32, heads=4, batch=2, seq=8.
    B, S, H, NH = 2, 8, 32, 4
    D = H // NH

    key = jax.random.PRNGKey(0)
    k_h, k_wq, k_wk, k_wv, k_bq, k_bk, k_bv = jax.random.split(key, 7)
    hidden_states = jax.random.normal(k_h, (B, S, H), dtype=jnp.float32)

    # nn.Linear parameters in PyTorch layout: weight [out, in], bias [out].
    wq = jax.random.normal(k_wq, (H, H), dtype=jnp.float32) * 0.05
    wk = jax.random.normal(k_wk, (H, H), dtype=jnp.float32) * 0.05
    wv = jax.random.normal(k_wv, (H, H), dtype=jnp.float32) * 0.05
    bq = jax.random.normal(k_bq, (H,), dtype=jnp.float32) * 0.02
    bk = jax.random.normal(k_bk, (H,), dtype=jnp.float32) * 0.02
    bv = jax.random.normal(k_bv, (H,), dtype=jnp.float32) * 0.02

    # Standard BERT extended additive mask [B, 1, 1, S]: 0 = keep, -1e4 = masked.
    keep = jnp.ones((B, S), dtype=jnp.float32).at[1, -2:].set(0.0)
    attention_mask = (1.0 - keep)[:, None, None, :] * -10000.0

    params = prepare_bert_attention_params(wq, bq, wk, bk, wv, bv, num_heads=NH)
    out = bert_self_attention(hidden_states, attention_mask, params, num_heads=NH)
    jax.block_until_ready(out)

    # Pure-JAX reference (mirrors the PyTorch forward).
    q = hidden_states @ wq.T + bq
    k = hidden_states @ wk.T + bk
    v = hidden_states @ wv.T + bv

    def split_heads(x):
        return x.reshape(B, S, NH, D).transpose(0, 2, 1, 3)   # [B, NH, S, D]

    qh, kh, vh = split_heads(q), split_heads(k), split_heads(v)
    scores = jnp.einsum('bhqd,bhkd->bhqk', qh, kh) / math.sqrt(D)
    scores = scores + attention_mask
    probs = jax.nn.softmax(scores, axis=-1)
    ctx = jnp.einsum('bhqk,bhkd->bhqd', probs, vh)
    ref = ctx.transpose(0, 2, 1, 3).reshape(B, S, H)

    # Tolerance widened slightly for the approx (EUP) reciprocal in softmax.
    assert jnp.allclose(out, ref, atol=2e-3, rtol=2e-3), (
        float(jnp.max(jnp.abs(out - ref))))

    print("KERNEL_OK")
</pallas_src>

<mosaic_0001>
module attributes {stable_mosaic.version = 11 : i64} {
  func.func @_bert_attn_kernel(%arg0: i32, %arg1: i32, %arg2: memref<1x8x32xf32, #tpu.memory_space<vmem>>, %arg3: memref<1x1x8xf32, #tpu.memory_space<vmem>>, %arg4: memref<32x32xf32, #tpu.memory_space<vmem>>, %arg5: memref<32x32xf32, #tpu.memory_space<vmem>>, %arg6: memref<32x32xf32, #tpu.memory_space<vmem>>, %arg7: memref<1x32xf32, #tpu.memory_space<vmem>>, %arg8: memref<1x32xf32, #tpu.memory_space<vmem>>, %arg9: memref<1x32xf32, #tpu.memory_space<vmem>>, %arg10: memref<1x8x32xf32, #tpu.memory_space<vmem>>) attributes {dimension_semantics = [#tpu.dimension_semantics<parallel>, #tpu.dimension_semantics<parallel>], iteration_bounds = array<i64: 2, 1>, scalar_prefetch = 0 : i64, scratch_operands = 0 : i64, tpu.core_type = #tpu.core_type<tc>, window_params = [{transform_indices = @transform_0, window_bounds = array<i64: 1, 8, 32>}, {transform_indices = @transform_1, window_bounds = array<i64: 1, 1, 8>}, {transform_indices = @transform_2, window_bounds = array<i64: 32, 32>}, {transform_indices = @transform_3, window_bounds = array<i64: 32, 32>}, {transform_indices = @transform_4, window_bounds = array<i64: 32, 32>}, {transform_indices = @transform_5, window_bounds = array<i64: 1, 32>}, {transform_indices = @transform_6, window_bounds = array<i64: 1, 32>}, {transform_indices = @transform_7, window_bounds = array<i64: 1, 32>}, {transform_indices = @transform_8, window_bounds = array<i64: 1, 8, 32>}]} {
    %c0 = arith.constant 0 : index
    %c0_0 = arith.constant 0 : index
    %c0_1 = arith.constant 0 : index
    %0 = vector.load %arg2[%c0, %c0_0, %c0_1] : memref<1x8x32xf32, #tpu.memory_space<vmem>>, vector<1x8x32xf32>
    %1 = vector.shape_cast %0 : vector<1x8x32xf32> to vector<8x32xf32>
    %c0_2 = arith.constant 0 : index
    %c0_3 = arith.constant 0 : index
    %2 = vector.load %arg4[%c0_2, %c0_3] : memref<32x32xf32, #tpu.memory_space<vmem>>, vector<32x32xf32>
    %cst = arith.constant dense<0.000000e+00> : vector<8x32xf32>
    %3 = tpu.matmul %1, %2, %cst {dimension_numbers = #tpu.dot_dimension_numbers<[1], [0], [0], [1], [0, 0, 1, 1], [], []>} : vector<8x32xf32>, vector<32x32xf32>, vector<8x32xf32> -> vector<8x32xf32>
    %c0_4 = arith.constant 0 : index
    %c0_5 = arith.constant 0 : index
    %4 = vector.load %arg7[%c0_4, %c0_5] : memref<1x32xf32, #tpu.memory_space<vmem>>, vector<1x32xf32>
    %5 = vector.broadcast %4 : vector<1x32xf32> to vector<8x32xf32>
    %6 = arith.addf %3, %5 : vector<8x32xf32>
    %c0_6 = arith.constant 0 : index
    %c0_7 = arith.constant 0 : index
    %7 = vector.load %arg5[%c0_6, %c0_7] : memref<32x32xf32, #tpu.memory_space<vmem>>, vector<32x32xf32>
    %cst_8 = arith.constant dense<0.000000e+00> : vector<8x32xf32>
    %8 = tpu.matmul %1, %7, %cst_8 {dimension_numbers = #tpu.dot_dimension_numbers<[1], [0], [0], [1], [0, 0, 1, 1], [], []>} : vector<8x32xf32>, vector<32x32xf32>, vector<8x32xf32> -> vector<8x32xf32>
    %c0_9 = arith.constant 0 : index
    %c0_10 = arith.constant 0 : index
    %9 = vector.load %arg8[%c0_9, %c0_10] : memref<1x32xf32, #tpu.memory_space<vmem>>, vector<1x32xf32>
    %10 = vector.broadcast %9 : vector<1x32xf32> to vector<8x32xf32>
    %11 = arith.addf %8, %10 : vector<8x32xf32>
    %c0_11 = arith.constant 0 : index
    %c0_12 = arith.constant 0 : index
    %12 = vector.load %arg6[%c0_11, %c0_12] : memref<32x32xf32, #tpu.memory_space<vmem>>, vector<32x32xf32>
    %cst_13 = arith.constant dense<0.000000e+00> : vector<8x32xf32>
    %13 = tpu.matmul %1, %12, %cst_13 {dimension_numbers = #tpu.dot_dimension_numbers<[1], [0], [0], [1], [0, 0, 1, 1], [], []>} : vector<8x32xf32>, vector<32x32xf32>, vector<8x32xf32> -> vector<8x32xf32>
    %c0_14 = arith.constant 0 : index
    %c0_15 = arith.constant 0 : index
    %14 = vector.load %arg9[%c0_14, %c0_15] : memref<1x32xf32, #tpu.memory_space<vmem>>, vector<1x32xf32>
    %15 = vector.broadcast %14 : vector<1x32xf32> to vector<8x32xf32>
    %16 = arith.addf %13, %15 : vector<8x32xf32>
    %c0_16 = arith.constant 0 : index
    %c0_17 = arith.constant 0 : index
    %c0_18 = arith.constant 0 : index
    %17 = vector.load %arg3[%c0_16, %c0_17, %c0_18] : memref<1x1x8xf32, #tpu.memory_space<vmem>>, vector<1x1x8xf32>
    %18 = vector.shape_cast %17 : vector<1x1x8xf32> to vector<1x8xf32>
    %19 = vector.extract_strided_slice %6 {offsets = [0, 0], sizes = [8, 8], strides = [1, 1]} : vector<8x32xf32> to vector<8x8xf32>
    %20 = vector.extract_strided_slice %11 {offsets = [0, 0], sizes = [8, 8], strides = [1, 1]} : vector<8x32xf32> to vector<8x8xf32>
    %21 = vector.extract_strided_slice %16 {offsets = [0, 0], sizes = [8, 8], strides = [1, 1]} : vector<8x32xf32> to vector<8x8xf32>
    %cst_19 = arith.constant dense<0.000000e+00> : vector<8x8xf32>
    %22 = tpu.matmul %19, %20, %cst_19 {dimension_numbers = #tpu.dot_dimension_numbers<[1], [1], [0], [0], [0, 0, 1, 0], [], []>} : vector<8x8xf32>, vector<8x8xf32>, vector<8x8xf32> -> vector<8x8xf32>
    %23 = vector.broadcast %18 : vector<1x8xf32> to vector<8x8xf32>
    %24 = arith.addf %22, %23 : vector<8x8xf32>
    %cst_20 = arith.constant dense<0xFF800000> : vector<8xf32>
    %25 = vector.multi_reduction <maximumf>, %24, %cst_20 [1] : vector<8x8xf32> to vector<8xf32>
    %26 = vector.shape_cast %25 : vector<8xf32> to vector<8x1xf32>
    %27 = vector.broadcast %26 : vector<8x1xf32> to vector<8x8xf32>
    %28 = arith.subf %24, %27 : vector<8x8xf32>
    %29 = math.exp %28 : vector<8x8xf32>
    %cst_21 = arith.constant dense<0.000000e+00> : vector<8xf32>
    %30 = vector.multi_reduction <add>, %29, %cst_21 [1] : vector<8x8xf32> to vector<8xf32>
    %31 = vector.shape_cast %30 : vector<8xf32> to vector<8x1xf32>
    %32 = tpu.reciprocal %31 {approx = true} : vector<8x1xf32> -> vector<8x1xf32>
    %33 = vector.broadcast %32 : vector<8x1xf32> to vector<8x8xf32>
    %34 = arith.mulf %29, %33 : vector<8x8xf32>
    %cst_22 = arith.constant dense<0.000000e+00> : vector<8x8xf32>
    %35 = tpu.matmul %34, %21, %cst_22 {dimension_numbers = #tpu.dot_dimension_numbers<[1], [0], [0], [1], [0, 0, 1, 1], [], []>} : vector<8x8xf32>, vector<8x8xf32>, vector<8x8xf32> -> vector<8x8xf32>
    %c0_23 = arith.constant 0 : index
    %c0_24 = arith.constant 0 : index
    %c0_25 = arith.constant 0 : index
    %36 = vector.load %arg10[%c0_23, %c0_24, %c0_25] : memref<1x8x32xf32, #tpu.memory_space<vmem>>, vector<1x8x8xf32>
    %37 = vector.shape_cast %36 : vector<1x8x8xf32> to vector<8x8xf32>
    %38 = vector.shape_cast %35 : vector<8x8xf32> to vector<1x8x8xf32>
    tpu.vector_store %arg10[%c0_23, %c0_24, %c0_25], %38 {strides = array<i32>} : memref<1x8x32xf32, #tpu.memory_space<vmem>>, vector<1x8x8xf32>,
    %39 = vector.extract_strided_slice %6 {offsets = [0, 8], sizes = [8, 8], strides = [1, 1]} : vector<8x32xf32> to vector<8x8xf32>
    %40 = vector.extract_strided_slice %11 {offsets = [0, 8], sizes = [8, 8], strides = [1, 1]} : vector<8x32xf32> to vector<8x8xf32>
    %41 = vector.extract_strided_slice %16 {offsets = [0, 8], sizes = [8, 8], strides = [1, 1]} : vector<8x32xf32> to vector<8x8xf32>
    %cst_26 = arith.constant dense<0.000000e+00> : vector<8x8xf32>
    %42 = tpu.matmul %39, %40, %cst_26 {dimension_numbers = #tpu.dot_dimension_numbers<[1], [1], [0], [0], [0, 0, 1, 0], [], []>} : vector<8x8xf32>, vector<8x8xf32>, vector<8x8xf32> -> vector<8x8xf32>
    %43 = vector.broadcast %18 : vector<1x8xf32> to vector<8x8xf32>
    %44 = arith.addf %42, %43 : vector<8x8xf32>
    %cst_27 = arith.constant dense<0xFF800000> : vector<8xf32>
    %45 = vector.multi_reduction <maximumf>, %44, %cst_27 [1] : vector<8x8xf32> to vector<8xf32>
    %46 = vector.shape_cast %45 : vector<8xf32> to vector<8x1xf32>
    %47 = vector.broadcast %46 : vector<8x1xf32> to vector<8x8xf32>
    %48 = arith.subf %44, %47 : vector<8x8xf32>
    %49 = math.exp %48 : vector<8x8xf32>
    %cst_28 = arith.constant dense<0.000000e+00> : vector<8xf32>
    %50 = vector.multi_reduction <add>, %49, %cst_28 [1] : vector<8x8xf32> to vector<8xf32>
    %51 = vector.shape_cast %50 : vector<8xf32> to vector<8x1xf32>
    %52 = tpu.reciprocal %51 {approx = true} : vector<8x1xf32> -> vector<8x1xf32>
    %53 = vector.broadcast %52 : vector<8x1xf32> to vector<8x8xf32>
    %54 = arith.mulf %49, %53 : vector<8x8xf32>
    %cst_29 = arith.constant dense<0.000000e+00> : vector<8x8xf32>
    %55 = tpu.matmul %54, %41, %cst_29 {dimension_numbers = #tpu.dot_dimension_numbers<[1], [0], [0], [1], [0, 0, 1, 1], [], []>} : vector<8x8xf32>, vector<8x8xf32>, vector<8x8xf32> -> vector<8x8xf32>
    %c0_30 = arith.constant 0 : index
    %c0_31 = arith.constant 0 : index
    %c8 = arith.constant 8 : index
    %56 = vector.load %arg10[%c0_30, %c0_31, %c8] : memref<1x8x32xf32, #tpu.memory_space<vmem>>, vector<1x8x8xf32>
    %57 = vector.shape_cast %56 : vector<1x8x8xf32> to vector<8x8xf32>
    %58 = vector.shape_cast %55 : vector<8x8xf32> to vector<1x8x8xf32>
    tpu.vector_store %arg10[%c0_30, %c0_31, %c8], %58 {strides = array<i32>} : memref<1x8x32xf32, #tpu.memory_space<vmem>>, vector<1x8x8xf32>,
    %59 = vector.extract_strided_slice %6 {offsets = [0, 16], sizes = [8, 8], strides = [1, 1]} : vector<8x32xf32> to vector<8x8xf32>
    %60 = vector.extract_strided_slice %11 {offsets = [0, 16], sizes = [8, 8], strides = [1, 1]} : vector<8x32xf32> to vector<8x8xf32>
    %61 = vector.extract_strided_slice %16 {offsets = [0, 16], sizes = [8, 8], strides = [1, 1]} : vector<8x32xf32> to vector<8x8xf32>
    %cst_32 = arith.constant dense<0.000000e+00> : vector<8x8xf32>
    %62 = tpu.matmul %59, %60, %cst_32 {dimension_numbers = #tpu.dot_dimension_numbers<[1], [1], [0], [0], [0, 0, 1, 0], [], []>} : vector<8x8xf32>, vector<8x8xf32>, vector<8x8xf32> -> vector<8x8xf32>
    %63 = vector.broadcast %18 : vector<1x8xf32> to vector<8x8xf32>
    %64 = arith.addf %62, %63 : vector<8x8xf32>
    %cst_33 = arith.constant dense<0xFF800000> : vector<8xf32>
    %65 = vector.multi_reduction <maximumf>, %64, %cst_33 [1] : vector<8x8xf32> to vector<8xf32>
    %66 = vector.shape_cast %65 : vector<8xf32> to vector<8x1xf32>
    %67 = vector.broadcast %66 : vector<8x1xf32> to vector<8x8xf32>
    %68 = arith.subf %64, %67 : vector<8x8xf32>
    %69 = math.exp %68 : vector<8x8xf32>
    %cst_34 = arith.constant dense<0.000000e+00> : vector<8xf32>
    %70 = vector.multi_reduction <add>, %69, %cst_34 [1] : vector<8x8xf32> to vector<8xf32>
    %71 = vector.shape_cast %70 : vector<8xf32> to vector<8x1xf32>
    %72 = tpu.reciprocal %71 {approx = true} : vector<8x1xf32> -> vector<8x1xf32>
    %73 = vector.broadcast %72 : vector<8x1xf32> to vector<8x8xf32>
    %74 = arith.mulf %69, %73 : vector<8x8xf32>
    %cst_35 = arith.constant dense<0.000000e+00> : vector<8x8xf32>
    %75 = tpu.matmul %74, %61, %cst_35 {dimension_numbers = #tpu.dot_dimension_numbers<[1], [0], [0], [1], [0, 0, 1, 1], [], []>} : vector<8x8xf32>, vector<8x8xf32>, vector<8x8xf32> -> vector<8x8xf32>
    %c0_36 = arith.constant 0 : index
    %c0_37 = arith.constant 0 : index
    %c16 = arith.constant 16 : index
    %76 = vector.load %arg10[%c0_36, %c0_37, %c16] : memref<1x8x32xf32, #tpu.memory_space<vmem>>, vector<1x8x8xf32>
    %77 = vector.shape_cast %76 : vector<1x8x8xf32> to vector<8x8xf32>
    %78 = vector.shape_cast %75 : vector<8x8xf32> to vector<1x8x8xf32>
    tpu.vector_store %arg10[%c0_36, %c0_37, %c16], %78 {strides = array<i32>} : memref<1x8x32xf32, #tpu.memory_space<vmem>>, vector<1x8x8xf32>,
    %79 = vector.extract_strided_slice %6 {offsets = [0, 24], sizes = [8, 8], strides = [1, 1]} : vector<8x32xf32> to vector<8x8xf32>
    %80 = vector.extract_strided_slice %11 {offsets = [0, 24], sizes = [8, 8], strides = [1, 1]} : vector<8x32xf32> to vector<8x8xf32>
    %81 = vector.extract_strided_slice %16 {offsets = [0, 24], sizes = [8, 8], strides = [1, 1]} : vector<8x32xf32> to vector<8x8xf32>
    %cst_38 = arith.constant dense<0.000000e+00> : vector<8x8xf32>
    %82 = tpu.matmul %79, %80, %cst_38 {dimension_numbers = #tpu.dot_dimension_numbers<[1], [1], [0], [0], [0, 0, 1, 0], [], []>} : vector<8x8xf32>, vector<8x8xf32>, vector<8x8xf32> -> vector<8x8xf32>
    %83 = vector.broadcast %18 : vector<1x8xf32> to vector<8x8xf32>
    %84 = arith.addf %82, %83 : vector<8x8xf32>
    %cst_39 = arith.constant dense<0xFF800000> : vector<8xf32>
    %85 = vector.multi_reduction <maximumf>, %84, %cst_39 [1] : vector<8x8xf32> to vector<8xf32>
    %86 = vector.shape_cast %85 : vector<8xf32> to vector<8x1xf32>
    %87 = vector.broadcast %86 : vector<8x1xf32> to vector<8x8xf32>
    %88 = arith.subf %84, %87 : vector<8x8xf32>
    %89 = math.exp %88 : vector<8x8xf32>
    %cst_40 = arith.constant dense<0.000000e+00> : vector<8xf32>
    %90 = vector.multi_reduction <add>, %89, %cst_40 [1] : vector<8x8xf32> to vector<8xf32>
    %91 = vector.shape_cast %90 : vector<8xf32> to vector<8x1xf32>
    %92 = tpu.reciprocal %91 {approx = true} : vector<8x1xf32> -> vector<8x1xf32>
    %93 = vector.broadcast %92 : vector<8x1xf32> to vector<8x8xf32>
    %94 = arith.mulf %89, %93 : vector<8x8xf32>
    %cst_41 = arith.constant dense<0.000000e+00> : vector<8x8xf32>
    %95 = tpu.matmul %94, %81, %cst_41 {dimension_numbers = #tpu.dot_dimension_numbers<[1], [0], [0], [1], [0, 0, 1, 1], [], []>} : vector<8x8xf32>, vector<8x8xf32>, vector<8x8xf32> -> vector<8x8xf32>
    %c0_42 = arith.constant 0 : index
    %c0_43 = arith.constant 0 : index
    %c24 = arith.constant 24 : index
    %96 = vector.load %arg10[%c0_42, %c0_43, %c24] : memref<1x8x32xf32, #tpu.memory_space<vmem>>, vector<1x8x8xf32>
    %97 = vector.shape_cast %96 : vector<1x8x8xf32> to vector<8x8xf32>
    %98 = vector.shape_cast %95 : vector<8x8xf32> to vector<1x8x8xf32>
    tpu.vector_store %arg10[%c0_42, %c0_43, %c24], %98 {strides = array<i32>} : memref<1x8x32xf32, #tpu.memory_space<vmem>>, vector<1x8x8xf32>,
    return
  }
  func.func @transform_0(%arg0: i32, %arg1: i32) -> (i32, i32, i32) {
    %c0_i32 = arith.constant 0 : i32
    %c0_i32_0 = arith.constant 0 : i32
    %c0_i32_1 = arith.constant 0 : i32
    return %arg0, %c0_i32, %c0_i32_0 : i32, i32, i32
  }
  func.func @transform_1(%arg0: i32, %arg1: i32) -> (i32, i32, i32) {
    %c0_i32 = arith.constant 0 : i32
    %c0_i32_0 = arith.constant 0 : i32
    %c0_i32_1 = arith.constant 0 : i32
    return %arg0, %c0_i32, %c0_i32_0 : i32, i32, i32
  }
  func.func @transform_2(%arg0: i32, %arg1: i32) -> (i32, i32) {
    %c0_i32 = arith.constant 0 : i32
    %c0_i32_0 = arith.constant 0 : i32
    return %c0_i32, %arg1 : i32, i32
  }
  func.func @transform_3(%arg0: i32, %arg1: i32) -> (i32, i32) {
    %c0_i32 = arith.constant 0 : i32
    %c0_i32_0 = arith.constant 0 : i32
    return %c0_i32, %arg1 : i32, i32
  }
  func.func @transform_4(%arg0: i32, %arg1: i32) -> (i32, i32) {
    %c0_i32 = arith.constant 0 : i32
    %c0_i32_0 = arith.constant 0 : i32
    return %c0_i32, %arg1 : i32, i32
  }
  func.func @transform_5(%arg0: i32, %arg1: i32) -> (i32, i32) {
    %c0_i32 = arith.constant 0 : i32
    %c0_i32_0 = arith.constant 0 : i32
    return %c0_i32, %arg1 : i32, i32
  }
  func.func @transform_6(%arg0: i32, %arg1: i32) -> (i32, i32) {
    %c0_i32 = arith.constant 0 : i32
    %c0_i32_0 = arith.constant 0 : i32
    return %c0_i32, %arg1 : i32, i32
  }
  func.func @transform_7(%arg0: i32, %arg1: i32) -> (i32, i32) {
    %c0_i32 = arith.constant 0 : i32
    %c0_i32_0 = arith.constant 0 : i32
    return %c0_i32, %arg1 : i32, i32
  }
  func.func @transform_8(%arg0: i32, %arg1: i32) -> (i32, i32, i32) {
    %c0_i32 = arith.constant 0 : i32
    %c0_i32_0 = arith.constant 0 : i32
    return %arg0, %c0_i32, %arg1 : i32, i32, i32
  }
}

</mosaic_0001>

<bundles_post_ra>
// kernel: tpu_custom_call.1
= control target key start
LH: loop header
LB: loop body
LE: loop exit
PB: predicated region body
PF: predicated region fallthrough
CT: control target
= control target key end

     0   :  { %s2485_s0 = inlined_call_operand.hbm [shape: f32[2,8,32], index: 0, kind: input, shape index: {}]   ;;  %s2486_s1 = inlined_call_operand.vmem [shape: f32[2,1,8], index: 1, kind: input, shape index: {}]   ;;  %s2487_s2 = inlined_call_operand.hbm [shape: f32[32,32], index: 2, kind: input, shape index: {}]   ;;  %s2488_s3 = inlined_call_operand.hbm [shape: f32[32,32], index: 3, kind: input, shape index: {}]   ;;  %s2489_s4 = inlined_call_operand.hbm [shape: f32[32,32], index: 4, kind: input, shape index: {}]   ;;  %s2490_s5 = inlined_call_operand.vmem [shape: f32[1,32], index: 5, kind: input, shape index: {}]   ;;  %s2491_s6 = inlined_call_operand.vmem [shape: f32[1,32], index: 6, kind: input, shape index: {}]   ;;  %s2492_s7 = inlined_call_operand.vmem [shape: f32[1,32], index: 7, kind: input, shape index: {}]   ;;  %s2493_s8 = inlined_call_operand.hbm [shape: f32[2,8,32], index: 8, kind: output, shape index: {}]  }
   0x1   :  { %2502 = sst [smem:[#allocation18_spill]] %s2486_s1 }
   0x2   :  { %2503 = sst [smem:[#allocation19_spill]] %s2493_s8 }
   0x3   :  { %13 = vsyncpa [#allocation3], 0 }
   0x4   :  { %15 = vsyncpa [#allocation3 + $0x1], 0 }
   0x5   :  { %16 = vsyncpa [#allocation6], 0 }
   0x6   :  { %17 = vsyncpa [#allocation9], 0 }
   0x7   :  { %18 = vsyncpa [#allocation4], 0 }
   0x8   :  { %20 = vsyncpa [#allocation4 + $0x1], 0  ;;  %s2111_s27 = smov 0   ;;  %s2113_s28 = smov 0  }
   0x9   :  { %s2115_s29 = smov 0   ;;  %s2117_s30 = smov 0  }
   0xa   :  { %s2119_s9 = smov 0   ;;  %s2121_s10 = smov 0  }
   0xb LB: > { %2504 = sst [smem:[#allocation15_spill]] %s2028_s27  ;;  %s1561_s11 = sadd.s32 4294967295, %s2048_s10   ;;  %s2048_s10 = sphi %s2121_s10, %s26_s10   ;;  %s2044_s9 = sphi %s2119_s9, %s2531_s9   ;;  %s2040_s30 = sphi %s2117_s30, %s2530_s30   ;;  %s2036_s29 = sphi %s2115_s29, %s2529_s29   ;;  %s2032_s28 = sphi %s2113_s28, %s2528_s28   ;;  %s2028_s27 = sphi %s2111_s27, %s2527_s27  }
   0xc   : > { %2505 = sst [smem:[#allocation16_spill]] %s2040_s30  ;;  %s1562_s12 = sadd.s32 4294967294, %s2048_s10  }
   0xd   : > { %p58_p0 = scmp.ne.s32.totalorder %s2032_s28, %s2028_s27  ;;  %p2145_p1 = scmp.eq.s32.totalorder %s1561_s11, 0 }
   0xe   : > { %p2149_p2 = scmp.eq.s32.totalorder %s1561_s11, 1  ;;  %p272_p3 = scmp.eq.s32.totalorder %s1562_s12, 1 }
   0xf   : > { %s2506_s13 = scalar_select %p2145_p1, 1, 0 }
  0x10   : > { %s2507_s14 = scalar_select %p2149_p2, 1, 0 }
  0x11   : > { %p2155_p4 = por %p2145_p1, %p58_p0  ;;  %p1563_p5 = scmp.ge.s32.totalorder %s2048_s10, 1 }
  0x12   : > { %p2160_p6 = por %p272_p3, %p58_p0  ;;  %p279_p7 = scmp.lt.s32.totalorder %s2048_s10, 3 }
  0x13   : > { %s2508_s15 = scalar_select %p2155_p4, 1, 0 }
  0x14   : > { %s2509_s16 = scalar_select %p2160_p6, 1, 0 }
  0x15   : > { %p2165_p8 = pnand %p1563_p5, %p279_p7  ;;  %s2050_s18 = smov [#allocation5]  }
  0x16   : > { %2510 = sst [smem:[#allocation17_spill]] %s2509_s16  ;;  %s293_s19 = sshll.u32 %s2050_s18, 4  ;;  %s2169_s19 = int_to_ptr.vmem [resolvable:$true] %s293_s19 }
  0x17   : > { %s2511_s17 = scalar_select %p2165_p8, 1, 0 }
  0x18   : > { %p1740_p9 = pneg %p2165_p8  ;;  %s2051_s21 = smov [#allocation7]  }
  0x19   : > { %s308_s22 = sshll.u32 %s2051_s21, 4  ;;  %s2052_s23 = smov [#allocation8]   ;;  %s2180_s22 = int_to_ptr.vmem [resolvable:$true] %s308_s22 }
  0x1a   : > { %p2176_p11 = pnand %p1740_p9, %p2145_p1  ;;  %s2182_s24 = sshll.u32 %s2052_s23, 4  ;;  %s324_s24 = int_to_ptr.vmem [resolvable:$true] %s2182_s24 }
  0x1b   : > { %s1844_s11 = scalar_lea.hbm %s2487_s2, 512 }
  0x1c   : > { %p1845_p12 = scmp.ne.s32.totalorder %s2487_s2, %s1844_s11  ;;  %p2192_p13 = pneg %p2176_p11 }
  0x1d   : > { %p1851_p5 = scmp.lt.u32.totalorder %s1844_s11, %s2487_s2 }
  0x1e   : > { %p1847_p0 = pnand %p2192_p13, %p1845_p12 }
  0x20   : > { %p1848_p3 = pneg %p1847_p0 }
  0x22   : > { %p1853_p7 = pnand %p1851_p5, %p1848_p3 }
  0x24   : > { %1856 = shalt.err (!%p1853_p7)
}
  0x25   : > { %s1857_s25 = scalar_lea.vmem %s2169_s19, 512  ;;  %p1865_p1 = scmp.lt.s32.totalorder %s2169_s19, %s2169_s19 }
  0x26   : > { %p1858_p9 = scmp.ne.s32.totalorder %s2169_s19, %s1857_s25  ;;  %p1866_p4 = scmp.lt.s32.totalorder %s1857_s25, %s1857_s25 }
  0x28   : > { %p1860_p10 = pnand %p1858_p9, %p2192_p13  ;;  %p1867_p12 = por %p1866_p4, %p1865_p1 }
  0x2a   : > { %p1861_p6 = pneg %p1860_p10 }
  0x2c   : > { %p1868_p0 = pnand %p1867_p12, %p1861_p6 }
  0x2e   : > { %1871 = shalt.err (!%p1868_p0)
}
  0x2f   : > { %s2053_s26 = smov 128   ;;  %s2054_s11 = smov 8  }
  0x30   : > { %1743 = dma.hbm_to_vmem [thread:$0]  (!%p2176_p11), %s2487_s2, 512, %s2169_s19, [#allocation6], %s2053_s26, %s2053_s26, %s2054_s11  }
  0x31   : > { %s1872_s25 = scalar_lea.hbm %s2488_s3, 512 }
  0x32   : > { %p1873_p1 = scmp.ne.s32.totalorder %s2488_s3, %s1872_s25  ;;  %p1879_p10 = scmp.lt.u32.totalorder %s1872_s25, %s2488_s3 }
  0x34   : > { %p1875_p4 = pnand %p1873_p1, %p2192_p13 }
  0x36   : > { %p1876_p6 = pneg %p1875_p4 }
  0x38   : > { %p1881_p3 = pnand %p1879_p10, %p1876_p6 }
  0x3a   : > { %1884 = shalt.err (!%p1881_p3)
}
  0x3b   : > { %s1885_s19 = scalar_lea.vmem %s2180_s22, 512  ;;  %p1893_p12 = scmp.lt.s32.totalorder %s2180_s22, %s2180_s22 }
  0x3c   : > { %p1886_p5 = scmp.ne.s32.totalorder %s2180_s22, %s1885_s19  ;;  %p1894_p0 = scmp.lt.s32.totalorder %s1885_s19, %s1885_s19 }
  0x3e   : > { %p1888_p7 = pnand %p1886_p5, %p2192_p13  ;;  %p1895_p1 = por %p1894_p0, %p1893_p12 }
  0x40   : > { %p1889_p9 = pneg %p1888_p7 }
  0x42   : > { %p1896_p4 = pnand %p1895_p1, %p1889_p9 }
  0x44   : > { %1899 = shalt.err (!%p1896_p4)
}
  0x45   : > { %1746 = dma.hbm_to_vmem [thread:$0]  (!%p2176_p11), %s2488_s3, 512, %s2180_s22, [#allocation6], %s2053_s26, %s2053_s26, %s2054_s11  }
  0x46   : > { %s1900_s12 = scalar_lea.hbm %s2489_s4, 512 }
  0x47   : > { %p1901_p6 = scmp.ne.s32.totalorder %s2489_s4, %s1900_s12  ;;  %p1907_p5 = scmp.lt.u32.totalorder %s1900_s12, %s2489_s4 }
  0x49   : > { %p1903_p10 = pnand %p1901_p6, %p2192_p13 }
  0x4b   : > { %p1904_p3 = pneg %p1903_p10 }
  0x4d   : > { %p1909_p7 = pnand %p1907_p5, %p1904_p3 }
  0x4f   : > { %1912 = shalt.err (!%p1909_p7)
}
  0x50   : > { %s1913_s19 = scalar_lea.vmem %s324_s24, 512  ;;  %p1921_p1 = scmp.lt.s32.totalorder %s324_s24, %s324_s24 }
  0x51   : > { %p1914_p9 = scmp.ne.s32.totalorder %s324_s24, %s1913_s19  ;;  %p1922_p4 = scmp.lt.s32.totalorder %s1913_s19, %s1913_s19 }
  0x53   : > { %p1916_p12 = pnand %p1914_p9, %p2192_p13  ;;  %p1923_p8 = por %p1922_p4, %p1921_p1 }
  0x55   : > { %p1917_p0 = pneg %p1916_p12 }
  0x57   : > { %p1924_p2 = pnand %p1923_p8, %p1917_p0 }
  0x59   : > { %1927 = shalt.err (!%p1924_p2)
}
  0x5a   : > { %1749 = dma.hbm_to_vmem [thread:$0]  (!%p2176_p11), %s2489_s4, 512, %s324_s24, [#allocation9], %s2053_s26, %s2053_s26, %s2054_s11  }
  0x5b   : > { %s45_s16 = sadd.s32 1, %s2036_s29  ;;  %s38_s20 = sadd.s32 1, %s2044_s9 }
  0x5c   : > { %p52_p2 = scmp.ne.s32.totalorder %s2036_s29, %s2032_s28  ;;  %p40_p8 = scmp.ge.s32.totalorder %s38_s20, 2 }
  0x5d   : > { %p53_p13 = scmp.eq.s32.totalorder %s2048_s10, 0  ;;  %p2514_p6 = scmp.ne.s32.totalorder %s2507_s14, 0 }
  0x5e   : > { %p1761_p3 = scmp.lt.s32.totalorder %s2048_s10, 2  ;;  %s2533_s20 = smov (%p40_p8, %s38_s20), 0 }
  0x5f   : > { %p2271_p10 = por %p2514_p6, %p52_p2  ;;  %p54_p5 = por %p53_p13, %p52_p2 }
  0x60   : > { %s355_s27 = sand.u32 1, %s2036_s29   ;;  %s42_s30 = ssub.s32 %s2044_s9, %s2533_s20 }
  0x61   : > { %p43_p7 = scmp.eq.s32.totalorder %s42_s30, 0  ;;  %s1571_s24 = sshll.u32 %s355_s27, 3 }
  0x62   : > { %s1572_s26 = sshll.u32 %s2044_s9, 7  ;;  %s359_s21 = scalar_lea.vmem [#allocation2], %s1571_s24 }
  0x63   : > { %s2283_s11 = scalar_select %p43_p7, %s2036_s29, %s45_s16  }
  0x64   : > { %s2288_s14 = scalar_lea.hbm %s2485_s0, %s1572_s26  ;;  %s366_s23 = sshll.u32 %s359_s21, 4  ;;  %s2290_s23 = int_to_ptr.vmem [resolvable:$true] %s366_s23 }
  0x65   : > { %p2294_p11 = pnand %p1761_p3, %p54_p5  ;;  %s356_s19 = scalar_lea.sflag [#allocation3], %s355_s27 }
  0x66   : > { %s1928_s22 = scalar_lea.hbm %s2288_s14, 128  ;;  %s1933_s30 = scalar_lea.hbm %s2485_s0, 256 }
  0x67   : > { %p1929_p9 = scmp.ne.s32.totalorder %s2288_s14, %s1928_s22  ;;  %p1930_p12 = pneg %p2294_p11 }
  0x68   : > { %p1934_p4 = scmp.lt.u32.totalorder %s2288_s14, %s2485_s0  ;;  %p1935_p2 = scmp.lt.u32.totalorder %s1933_s30, %s1928_s22 }
  0x69   : > { %p1931_p0 = pnand %p1930_p12, %p1929_p9  ;;  %p1937_p13 = scmp.lt.u32.totalorder %s1928_s22, %s2288_s14 }
  0x6a   : > { %p1936_p8 = por %p1935_p2, %p1934_p4 }
  0x6b   : > { %p1932_p1 = pneg %p1931_p0 }
  0x6c   : > { %p1938_p6 = por %p1937_p13, %p1936_p8 }
  0x6e   : > { %p1939_p3 = pnand %p1938_p6, %p1932_p1 }
  0x70   : > { %1942 = shalt.err (!%p1939_p3)
}
  0x71   : > { %s1943_s27 = scalar_lea.vmem %s2290_s23, 128  ;;  %s2055_s12 = smov [#allocation2]  }
  0x72   : > { %p1944_p5 = scmp.ne.s32.totalorder %s2290_s23, %s1943_s27  ;;  %s1948_s18 = sshll.u32 %s2055_s12, 4  ;;  %s1949_s18 = int_to_ptr.vmem [resolvable:$false] %s1948_s18 }
  0x73   : > { %s1950_s21 = scalar_lea.vmem %s1949_s18, 256  ;;  %p1951_p0 = scmp.lt.s32.totalorder %s2290_s23, %s1949_s18 }
  0x74   : > { %p1946_p7 = pnand %p1944_p5, %p1930_p12  ;;  %p1952_p4 = scmp.lt.s32.totalorder %s1950_s21, %s1943_s27 }
  0x76   : > { %p1947_p9 = pneg %p1946_p7  ;;  %p1953_p2 = por %p1952_p4, %p1951_p0 }
  0x78   : > { %p1954_p8 = pnand %p1953_p2, %p1947_p9 }
  0x7a   : > { %1957 = shalt.err (!%p1954_p8)
}
  0x7b   : > { %1753 = dma.hbm_to_vmem [thread:$0]  (!%p2294_p11), %s2288_s14, 128, %s2290_s23, %s356_s19  }
  0x7c   : > { %p2517_p1 = scmp.ne.s32.totalorder %s2511_s17, 0 }
  0x7d   : > { %s2326_s22 = sand.u32 (!%p2517_p1), 1, %s2032_s28   ;;  %p2518_p12 = scmp.ne.s32.totalorder (!%p2517_p1), %s2508_s15, 0 }
  0x7e   : > { %381 = sbr.rel (%p2517_p1) target bundleno = 1361 (0x551), region = 52  ;;  %s1574_s1 = sshll.u32 (!%p2517_p1), %s2326_s22, 3 }
  0x7f   : > { %s384_s16 = scalar_lea.sflag (!%p2517_p1), [#allocation3], %s2326_s22  ;;  %s2332_s30 = scalar_lea.vmem (!%p2517_p1), [#allocation2], %s1574_s1 }
  0x85   : > { %2011 = dma.done.wait (%p2518_p12), %s384_s16, 128  }
  0x86   : > { %2013 = vsyncadd (%p2518_p12), %s384_s16, 4294967168  ;;  %p2519_p11 = scmp.ne.s32.totalorder %s2506_s13, 0 }
  0x88   : > { %2015 = dma.done.wait (%p2519_p11), [#allocation6], 1024  }
  0x89   : > { %2017 = vsyncadd (%p2519_p11), [#allocation6], 4294966272 }
  0x8a   : > { %2019 = dma.done.wait (%p2519_p11), [#allocation9], 512  }
  0x8b   : > { %2021 = vsyncadd (%p2519_p11), [#allocation9], 4294966784  ;;  %v2056_v0 = vmov 0.0|0.0   ;;  %vm2057_vm0 = vmmov 0   ;;  %v2058_v1 = vmov 0.0   ;;  %v542_v2 = vld [vmem:[#allocation7] sm:$0xff] }
  0x8c   : > { %1712 = vmatprep.subr.bf16.mxu1 %v2056_v0  ;;  %1706 = vmatprep.subr.bf16.mxu0 %v2056_v0  ;;  %v543_v3 = vld [vmem:[#allocation7 + $0x8] sm:$0xff]  ;;  %v457_v4 = vld [vmem:[#allocation5] sm:$0xff]  ;;  %v544_v7 = vld [vmem:[#allocation7 + $0x10] sm:$0xff]  ;;  %vm468_vm1 = vcmask 261120   ;;  %vm711_vm2 = vcmask 64512   ;;  %s2059_s23 = smov 112  }
  0x8d   : > { %1652 = vmatprep.mubr.msk.f32.mxu1 %vm2057_vm0, %v2058_v1  ;;  %1641 = vmatprep.mubr.msk.f32.mxu0 %vm2057_vm0, %v2058_v1  ;;  %v1713_v5 = vpack.c.bf16 %v543_v3, %v542_v2  ;;  %v458_v6 = vld [vmem:[#allocation5 + $0x8] sm:$0xff]  ;;  %v545_v8 = vld [vmem:[#allocation7 + $0x18] sm:$0xff]  ;;  %v459_v10 = vld [vmem:[#allocation5 + $0x10] sm:$0xff]  ;;  %s2060_s25 = smov 120   ;;  %s2061_s19 = smov 104   ;;  %vm1043_vm3 = vcmask 130112  }
  0x8e   : > { %v1707_v9 = vpack.c.bf16 %v458_v6, %v457_v4  ;;  %v460_v11 = vld [vmem:[#allocation5 + $0x18] sm:$0xff]  ;;  %v1716_v12 = vpack.c.bf16 %v545_v8, %v544_v7  ;;  %v623_v15 = vld [vmem:[#allocation8] sm:$0xff]  ;;  %v624_v16 = vld [vmem:[#allocation8 + $0x8] sm:$0xff]  ;;  %s2520_s27 = sld [smem:[#allocation16_spill]]  ;;  %s2521_s16 = sld [smem:[#allocation18_spill]]  ;;  %vm1214_vm4 = vcmask 195712  }
  0x8f   : > { %1714 = vmatpush3.bf16.msra.mxu1 %v1713_v5  ;;  %v1710_v13 = vpack.c.bf16 %v460_v11, %v459_v10  ;;  %v456_v14 = vld [vmem:[%s2332_s30] sm:$0xff]  ;;  %v1719_v18 = vpack.c.bf16 %v624_v16, %v623_v15  ;;  %s443_s13 = scalar_lea.vmem [#allocation10], %s1574_s1  ;;  %s2062_s15 = smov 8   ;;  %vm1385_vm5 = vcmask 261312  }
  0x90   : > { %1708 = vmatpush3.bf16.msra.mxu0 %v1707_v9  ;;  %1715 = vmatprep.subr.bf16.mxu1 %v2056_v0  ;;  %v625_v17 = vld [vmem:[#allocation8 + $0x10] sm:$0xff]  ;;  %v626_v19 = vld [vmem:[#allocation8 + $0x18] sm:$0xff]  ;;  %s2063_s17 = smov 16   ;;  %s2064_s14 = smov 24  }
  0x91   : > { %1709 = vmatprep.subr.bf16.mxu0 %v2056_v0  ;;  %v1722_v20 = vpack.c.bf16 %v626_v19, %v625_v17  ;;  %v1581_v21 = vld [vmem:[%s2491_s6] ss:$0 sm:$0xff]  ;;  %s2522_s24 = sld [smem:[#allocation19_spill]] }
  0x92   : > { %v1579_v23 = vld [vmem:[%s2490_s5] ss:$0 sm:$0xff] }
  0x93   : > { %1717 = vmatpush3.bf16.msra.mxu1 %v1716_v12  ;;  %v1583_v29 = vld [vmem:[%s2492_s7] ss:$0 sm:$0xff] }
  0x94   : > { %1711 = vmatpush3.bf16.msra.mxu0 %v1710_v13  ;;  %1666 = vmatprep.subr.mxu1 %v2058_v1  ;;  %p444_p13 = scmp.lt.s32.totalorder %s2520_s27, 1  ;;  %s1599_s1 = sshll.u32 %s2520_s27, 7 }
  0x95   : > { %1718 = vmatprep.subr.bf16.mxu0 %v2056_v0 }
  0x96   : > { %1653 = vmatmul.mubr.msk.f32.vlgmr.msra.gmra.mrb[0].mxu1 %vm468_vm1, %v456_v14  ;;  %s445_s12 = scalar_select %p444_p13, %s2520_s27, 1 }
  0x97   : > { %1642 = vmatmul.mubr.msk.f32.vlgmr.msra.gmra.mrb[0].mxu0 %vm468_vm1, %v456_v14  ;;  %1668 = vmatprep.mubr.msk.f32.mxu1 %vm2057_vm0, %v2058_v1  ;;  %s2436_s26 = scalar_lea.hbm %s2522_s24, %s1599_s1  ;;  %s2065_s27 = smov [#allocation10]  }
  0x98   : > { %1663 = vmatprep.mubr.msk.f32.mxu0 %vm2057_vm0, %v2058_v1  ;;  %1720 = vmatpush3.bf16.msra.mxu0 %v1719_v18  ;;  %s446_s30 = scalar_lea.vmem %s2521_s16, %s445_s12  ;;  %s1388_s12 = scalar_lea.sflag [#allocation4], %s2326_s22 }
  0x99   : > { %1721 = vmatprep.subr.bf16.mxu0 %v2056_v0  ;;  %v1585_v39 = vld [vmem:[%s446_s30] ss:$0 sm:$0xff]  ;;  %s1962_s21 = sshll.u32 %s2065_s27, 4  ;;  %s1963_s21 = int_to_ptr.vmem [resolvable:$false] %s1962_s21 }
  0x9a   : > { %s1964_s16 = scalar_lea.vmem %s1963_s21, 256 }
  0x9c   : > { %1723 = vmatpush3.bf16.msra.mxu0 %v1722_v20 }
  0x9d   : > { %1676 = vmatprep.subr.mxu0 %v2058_v1 }
  0x9f   : > { %1664 = vmatmul.mubr.msk.f32.vlgmr.msra.gmra.mrb[2].mxu0 %vm468_vm1, %v456_v14 }
  0xa0   : > { %1678 = vmatprep.mubr.msk.f32.mxu0 %vm2057_vm0, %v2058_v1 }
 0x169   : > { %v619_v22 = vpop.f32.mrb[0].mxu1 }
 0x16a   : > { %v620_v24 = vadd.f32 %v1581_v21, %v619_v22  ;;  %v1654_v25 = vpop.f32.mrb[1].mxu1  ;;  %v538_v26 = vpop.f32.mrb[0].mxu0 }
 0x16b   : > { %v1643_v27 = vpop.f32.mrb[1].mxu0  ;;  %v539_v28 = vadd.f32 %v1579_v23, %v538_v26 }
 0x16c   : > { %1047 = vrot.lane.b32.xlu1 %v620_v24, %s2059_s23  ;;  %875 = vrot.lane.b32.xlu0 %v620_v24, %s2060_s25 }
 0x16d   : > { %1667 = vmatpush3.xpose.msk.msra.mxu1 %vm711_vm2, %v620_v24 }
 0x16e   : > { %1671 = vmatprep.subr.mxu1 %v2058_v1 }
 0x170   : > { %1669 = vmatmul.mubr.msk.f32.vlgmr.msra.gmra.mrb[2].mxu1 %vm711_vm2, %v539_v28  ;;  %1045 = vrot.lane.b32.xlu1 %v539_v28, %s2059_s23 }
 0x171   : > { %873 = vrot.lane.b32.xlu0 %v539_v28, %s2060_s25  ;;  %1673 = vmatprep.mubr.msk.f32.mxu1 %vm2057_vm0, %v2058_v1 }
 0x172   : > { %v700_v30 = vpop.f32.mrb[2].mxu0 }
 0x173   : > { %v2382_v31 = vadd.f32 %v1583_v29, %v700_v30  ;;  %v1665_v32 = vpop.f32.mrb[3].mxu0 }
 0x174   : > { %1216 = vrot.lane.b32.xlu1 %v539_v28, %s2061_s19 }
 0x175   : > { %1218 = vrot.lane.b32.xlu0 %v620_v24, %s2061_s19  ;;  %1672 = vmatpush3.msra.mxu1 %v2382_v31 }
 0x176   : > { %1681 = vmatprep.subr.mxu1 %v2058_v1 }
 0x1de   : > { %v876_v33 = vpop.permute.xlu0 %875  ;;  %v1048_v34 = vpop.permute.xlu1 %1047 }
 0x1df   : > { %1677 = vmatpush3.xpose.msk.msra.mxu0 %vm711_vm2, %v876_v33 }
 0x1e0   : > { %1686 = vmatprep.subr.mxu0 %v2058_v1 }
 0x1e2   : > { %v1046_v36 = vpop.permute.xlu1 %1045 }
 0x1e3   : > { %v874_v35 = vpop.permute.xlu0 %873 }
 0x1e4   : > { %1679 = vmatmul.mubr.msk.f32.vlgmr.msra.gmra.mrb[4].mxu0 %vm711_vm2, %v874_v35 }
 0x1e5   : > { %1687 = vmatpush3.xpose.msk.msra.mxu0 %vm711_vm2, %v1048_v34  ;;  %1688 = vmatprep.mubr.msk.f32.mxu0 %vm2057_vm0, %v2058_v1 }
 0x1e6   : > { %1696 = vmatprep.subr.mxu0 %v2058_v1  ;;  %v1217_v38 = vpop.permute.xlu1 %1216 }
 0x1e7   : > { %v1219_v37 = vpop.permute.xlu0 %1218 }
 0x1e8   : > { %1689 = vmatmul.mubr.msk.f32.vlgmr.msra.gmra.mrb[6].mxu0 %vm711_vm2, %v1046_v36 }
 0x1e9   : > { %1697 = vmatpush3.xpose.msk.msra.mxu0 %vm711_vm2, %v1219_v37  ;;  %1698 = vmatprep.mubr.msk.f32.mxu0 %vm2057_vm0, %v2058_v1 }
 0x1ec   : > { %1699 = vmatmul.mubr.msk.f32.vlgmr.msra.gmra.mrb[8].mxu0 %vm711_vm2, %v1217_v38 }
 0x243   : > { %v784_v40 = vpop.f32.mrb[2].mxu1 }
 0x244   : > { %v785_v41 = vadd.f32 %v1585_v39, %v784_v40  ;;  %v1670_v42 = vpop.f32.mrb[3].mxu1 }
 0x246   : > { %v788_v43 = vsel %vm711_vm2, %v785_v41, -inf }
 0x247   : > { %789 = vmax.xlane.f32.xlu0 %v788_v43 }
 0x2b7   : > { %v947_v44 = vpop.f32.mrb[4].mxu0 }
 0x2b8   : > { %v948_v45 = vadd.f32 %v1585_v39, %v947_v44  ;;  %v1680_v46 = vpop.f32.mrb[5].mxu0 }
 0x2ba   : > { %v951_v47 = vsel %vm711_vm2, %v948_v45, -inf }
 0x2bb   : > { %952 = vmax.xlane.f32.xlu1 %v951_v47  ;;  %v1119_v48 = vpop.f32.mrb[6].mxu0 }
 0x2bc   : > { %v1120_v49 = vadd.f32 %v1585_v39, %v1119_v48  ;;  %v1690_v50 = vpop.f32.mrb[7].mxu0 }
 0x2be   : > { %v1123_v51 = vsel %vm711_vm2, %v1120_v49, -inf }
 0x2bf   : > { %1124 = vmax.xlane.f32.xlu0 %v1123_v51  ;;  %v1290_v52 = vpop.f32.mrb[8].mxu0 }
 0x2c0   : > { %v1291_v53 = vadd.f32 %v1585_v39, %v1290_v52  ;;  %v1700_v54 = vpop.f32.mrb[9].mxu0 }
 0x2c2   : > { %v1294_v55 = vsel %vm711_vm2, %v1291_v53, -inf }
 0x2c3   : > { %1295 = vmax.xlane.f32.xlu0 %v1294_v55 }
 0x2cc   : > { %963 = vrot.lane.b32.xlu1 %v2382_v31, %s2060_s25 }
 0x2d4   : > { %v790_v56 = vpop.xlane.xlu0 %789 }
 0x2d5   : > { %v791_v57 = vsub.f32 %v785_v41, %v790_v56 }
 0x2d7   : > { %v792_v58 = vmul.f32 1.442695, %v791_v57 }
 0x2d9   : > { %1828 = vpow2.f32 %v792_v58 }
 0x2e3   : > { %v1829_v59 = vpop.eup %1828 }
 0x2e4   : > { %v794_v60 = vsel %vm711_vm2, %v1829_v59, 0.0 }
 0x2f0   : > { %795 = vadd.xlane.f32.xlu1 %v794_v60 }
 0x348   : > { %v953_v61 = vpop.xlane.xlu1 %952 }
 0x349   : > { %v954_v62 = vsub.f32 %v948_v45, %v953_v61 }
 0x34b   : > { %v955_v63 = vmul.f32 1.442695, %v954_v62 }
 0x34c   : > { %v1125_v0 = vpop.xlane.xlu0 %1124  ;;  %v964_v13 = vpop.permute.xlu1 %963 }
 0x34d   : > { %1830 = vpow2.f32 %v955_v63  ;;  %v1126_v2 = vsub.f32 %v1120_v49, %v1125_v0 }
 0x34f   : > { %v1127_v3 = vmul.f32 1.442695, %v1126_v2 }
 0x350   : > { %v1296_v4 = vpop.xlane.xlu0 %1295 }
 0x351   : > { %1832 = vpow2.f32 %v1127_v3  ;;  %v1297_v5 = vsub.f32 %v1291_v53, %v1296_v4 }
 0x353   : > { %v1298_v6 = vmul.f32 1.442695, %v1297_v5 }
 0x355   : > { %1834 = vpow2.f32 %v1298_v6 }
 0x357   : > { %v1831_v7 = vpop.eup %1830 }
 0x358   : > { %v957_v8 = vsel %vm711_vm2, %v1831_v7, 0.0 }
 0x359   : > { %958 = vadd.xlane.f32.xlu0 %v957_v8 }
 0x35b   : > { %v1833_v9 = vpop.eup %1832 }
 0x35c   : > { %v1129_v10 = vsel %vm711_vm2, %v1833_v9, 0.0 }
 0x35d   : > { %1130 = vadd.xlane.f32.xlu1 %v1129_v10 }
 0x35f   : > { %v1835_v11 = vpop.eup %1834 }
 0x360   : > { %v1300_v12 = vsel %vm711_vm2, %v1835_v11, 0.0 }
 0x361   : > { %1301 = vadd.xlane.f32.xlu0 %v1300_v12 }
 0x36e   : > { %1305 = vrot.lane.b32.xlu1 %v2382_v31, %s2061_s19 }
 0x377   : > { %1134 = vrot.lane.b32.xlu0 %v2382_v31, %s2059_s23  ;;  %s1402_s23 = sshll.u32 %s443_s13, 4  ;;  %s2438_s23 = int_to_ptr.vmem [resolvable:$true] %s1402_s23 }
 0x378   : > { %s1958_s18 = scalar_lea.vmem %s2438_s23, 128  ;;  %p1965_p7 = scmp.lt.s32.totalorder %s2438_s23, %s1963_s21 }
 0x379   : > { %p1959_p6 = scmp.ne.s32.totalorder %s2438_s23, %s1958_s18  ;;  %p1966_p9 = scmp.lt.s32.totalorder %s1964_s16, %s1958_s18 }
 0x37b   : > { %p1960_p3 = pnand %p1959_p6, %p2271_p10  ;;  %p1967_p0 = por %p1966_p9, %p1965_p7 }
 0x37d   : > { %v796_v14 = vpop.xlane.xlu1 %795  ;;  %p1961_p5 = pneg %p1960_p3 }
 0x37e   : > { %1836 = vrcp.f32 %v796_v14 }
 0x37f   : > { %p1968_p4 = pnand %p1967_p0, %p1961_p5 }
 0x388   : > { %v1837_v15 = vpop.eup %1836 }
 0x389   : > { %v798_v16 = vmul.f32 %v1837_v15, %v1829_v59 }
 0x38b   : > { %1674 = vmatmul.mubr.msk.f32.vlgmr.msra.gmra.mrb[4].mxu1 %vm711_vm2, %v798_v16 }
 0x38c   : > { %1682 = vmatpush3.msra.mxu1 %v964_v13  ;;  %1683 = vmatprep.mubr.msk.f32.mxu1 %vm2057_vm0, %v2058_v1 }
 0x38d   : > { %1691 = vmatprep.subr.mxu1 %v2058_v1 }
 0x3e6   : > { %v959_v17 = vpop.xlane.xlu0 %958 }
 0x3e7   : > { %1838 = vrcp.f32 %v959_v17 }
 0x3ea   : > { %v1131_v18 = vpop.xlane.xlu1 %1130 }
 0x3eb   : > { %1840 = vrcp.f32 %v1131_v18 }
 0x3ee   : > { %v1302_v19 = vpop.xlane.xlu0 %1301  ;;  %v1306_v25 = vpop.permute.xlu1 %1305 }
 0x3ef   : > { %1842 = vrcp.f32 %v1302_v19 }
 0x3f1   : > { %v1839_v20 = vpop.eup %1838 }
 0x3f2   : > { %v961_v21 = vmul.f32 %v1839_v20, %v1831_v7  ;;  %v1135_v22 = vpop.permute.xlu0 %1134 }
 0x3f4   : > { %1684 = vmatmul.mubr.msk.f32.vlgmr.msra.gmra.mrb[6].mxu1 %vm711_vm2, %v961_v21 }
 0x3f5   : > { %v1841_v23 = vpop.eup %1840  ;;  %1692 = vmatpush3.msra.mxu1 %v1135_v22  ;;  %1693 = vmatprep.mubr.msk.f32.mxu1 %vm2057_vm0, %v2058_v1 }
 0x3f6   : > { %v1133_v24 = vmul.f32 %v1841_v23, %v1833_v9  ;;  %1701 = vmatprep.subr.mxu1 %v2058_v1 }
 0x3f8   : > { %1694 = vmatmul.mubr.msk.f32.vlgmr.msra.gmra.mrb[8].mxu1 %vm711_vm2, %v1133_v24 }
 0x3f9   : > { %v1843_v26 = vpop.eup %1842  ;;  %1702 = vmatpush3.msra.mxu1 %v1306_v25  ;;  %1703 = vmatprep.mubr.msk.f32.mxu1 %vm2057_vm0, %v2058_v1 }
 0x3fa   : > { %v1304_v27 = vmul.f32 %v1843_v26, %v1835_v11 }
 0x3fc   : > { %1704 = vmatmul.mubr.msk.f32.vlgmr.msra.gmra.mrb[10].mxu1 %vm711_vm2, %v1304_v27 }
 0x45e   : > { %v868_v28 = vpop.f32.mrb[4].mxu1 }
 0x45f   : > { %872 = vst.msk [vmem:[%s443_s13] sm:$0xff] %vm711_vm2, %v868_v28  ;;  %v1675_v29 = vpop.f32.mrb[5].mxu1 }
 0x4c7   : > { %v1035_v30 = vpop.f32.mrb[6].mxu1 }
 0x4c8   : > { %1040 = vrot.lane.b32.xlu1 %v1035_v30, %s2062_s15  ;;  %v1685_v31 = vpop.f32.mrb[7].mxu1 }
 0x4cb   : > { %v1206_v32 = vpop.f32.mrb[8].mxu1 }
 0x4cc   : > { %1211 = vrot.lane.b32.xlu0 %v1206_v32, %s2063_s17  ;;  %v1695_v33 = vpop.f32.mrb[9].mxu1 }
 0x4cf   : > { %v1377_v34 = vpop.f32.mrb[10].mxu1 }
 0x4d0   : > { %1382 = vrot.lane.b32.xlu1 %v1377_v34, %s2064_s14  ;;  %v1705_v1 = vpop.f32.mrb[11].mxu1 }
 0x53a   : > { %v1041_v35 = vpop.permute.xlu1 %1040 }
 0x53b   : > { %1044 = vst.msk [vmem:[%s443_s13] sm:$0xff] %vm1043_vm3, %v1041_v35 }
 0x53e   : > { %v1212_v36 = vpop.permute.xlu0 %1211 }
 0x53f   : > { %1215 = vst.msk [vmem:[%s443_s13] sm:$0xff] %vm1214_vm4, %v1212_v36 }
 0x542   : > { %v1383_v37 = vpop.permute.xlu1 %1382 }
 0x543   : > { %1386 = vst.msk [vmem:[%s443_s13] sm:$0xff] %vm1385_vm5, %v1383_v37 }
 0x544   : > { %1971 = shalt.err (!%p1968_p4)
}
 0x545   : > { %s1972_s22 = scalar_lea.hbm %s2436_s26, 128  ;;  %s1976_s15 = scalar_lea.hbm %s2522_s24, 256 }
 0x546   : > { %p1973_p2 = scmp.ne.s32.totalorder %s2436_s26, %s1972_s22  ;;  %p1977_p12 = scmp.lt.u32.totalorder %s2436_s26, %s2522_s24 }
 0x547   : > { %p1978_p11 = scmp.lt.u32.totalorder %s1976_s15, %s1972_s22  ;;  %p1980_p6 = scmp.lt.u32.totalorder %s1972_s22, %s2436_s26 }
 0x548   : > { %p1974_p8 = pnand %p1973_p2, %p2271_p10 }
 0x549   : > { %p1979_p13 = por %p1978_p11, %p1977_p12 }
 0x54a   : > { %p1975_p1 = pneg %p1974_p8 }
 0x54b   : > { %p1981_p3 = por %p1980_p6, %p1979_p13 }
 0x54d   : > { %p1982_p5 = pnand %p1981_p3, %p1975_p1 }
 0x54f   : > { %1985 = shalt.err (!%p1982_p5)
}
 0x550   : > { %1738 = dma.vmem_to_hbm [thread:$0]  (%p2271_p10), %s2438_s23, 128, %s2436_s26, %s1388_s12  }
 0x551 PF: > { %s2523_s1 = sld [smem:[#allocation15_spill]]  ;;  %s2524_s25 = sld [smem:[#allocation17_spill]] }
 0x552   : > { %p2526_p9 = scmp.ge.s32.totalorder %s2048_s10, 2 }
 0x557   : > { %s1414_s19 = sand.u32 1, %s2523_s1   ;;  %p2525_p7 = scmp.ne.s32.totalorder %s2524_s25, 0 }
 0x558   : > { %s1415_s18 = scalar_lea.sflag [#allocation4], %s1414_s19 }
 0x559   : > { %p1755_p0 = pnand %p2526_p9, %p2525_p7 }
 0x55b   : > { %2023 = dma.done.wait (!%p1755_p0), %s1415_s18, 128  }
 0x55c   : > { %2025 = vsyncadd (!%p1755_p0), %s1415_s18, 4294967168  ;;  %s26_s10 = sadd.s32 1, %s2048_s10   ;;  %s2527_s27 = smov %s2032_s28 }
 0x55d   : > { %p23_p4 = scmp.ge.s32.totalorder %s26_s10, 4   ;;  %s2528_s28 = smov %s2036_s29 }
 0x55e   : > { %s2529_s29 = smov %s2283_s11  ;;  %s2530_s30 = smov %s2044_s9 }
 0x55f   : > { %s2531_s9 = smov %s2533_s20  ;;  %25 = sbr.rel (!%p23_p4) target bundleno = 11 (0xb), region = 124 }
 0x566   :  { %1420 = vsyncpa [#allocation3], 1 }
 0x567   :  { %1422 = vsyncpa [#allocation3 + $0x1], 1 }
 0x568   :  { %1423 = vsyncpa [#allocation6], 1 }
 0x569   :  { %1424 = vsyncpa [#allocation9], 1 }
 0x56a   :  { %1425 = vsyncpa [#allocation4], 1 }
 0x56b   :  { %1427 = vsyncpa [#allocation4 + $0x1], 1 }

</bundles_post_ra>
